<compile_context>
chip_gen: v5e
topology: v5e:2x2
jax: 0.10.0
libtpu: 0.0.40
codegen_flags: <defaults>
</compile_context>

<pallas_src>
import jax
import jax.numpy as jnp
from jax.experimental import pallas as pl
from jax.experimental.pallas import tpu as pltpu


def bottleneck_kernel(gin_ref, whh_ref, wlin_ref, blin_ref, o_ref):
    """gin_ref: (T, B, 4H) precomputed x@Wih^T + (bih+bhh), gate order [i, f, o, g];
    whh_ref: (H, 4H) recurrent weights (transposed, same gate order);
    wlin_ref: (H, L); blin_ref: (1, L); o_ref: (B, L)."""
    T = gin_ref.shape[0]
    H = whh_ref.shape[0]

    h = None
    c = None
    # T is small and static: fully unroll so the LLO scheduler can overlap step t's
    # EUP/VPU gate math with step t+1's h@Whh MXU issue. h/c stay in vregs.
    for t in range(T):
        if t == 0:
            gates = gin_ref[0]                                # h0 == 0 -> skip h@Whh
        else:
            gates = gin_ref[t] + jnp.dot(
                h, whh_ref[...], preferred_element_type=jnp.float32)   # (B, 4H)
        # Gate order [i, f, o, g]: one sigmoid over the first 3H lanes, one tanh.
        s = jax.nn.sigmoid(gates[:, :3 * H])
        g = jnp.tanh(gates[:, 3 * H:])
        i = s[:, :H]
        f = s[:, H:2 * H]
        o = s[:, 2 * H:]
        c = i * g if t == 0 else f * c + i * g
        h = o * jnp.tanh(c)

    # Final hidden state -> Linear. Dropout(p=0.5) is identity in eval mode.
    # TODO(synk): training-mode dropout (random 0.5 mask + 2x scale) not implemented.
    o_ref[...] = (jnp.dot(h, wlin_ref[...], preferred_element_type=jnp.float32)
                  + blin_ref[...]).astype(o_ref.dtype)


def bottleneck_forward(x, wih, whh, bih, bhh, wlin, blin):
    """x: (B, T, D) batch_first, like the PyTorch module. Returns (B, L)."""
    B, T, D = x.shape
    H = whh.shape[1]
    L = wlin.shape[0]

    # Permute the 4H gate axis once: PyTorch's [i, f, g, o] -> [i, f, o, g] so the
    # kernel can apply a single sigmoid slab over the first 3H columns.
    perm = jnp.concatenate([jnp.arange(0, 2 * H),
                            jnp.arange(3 * H, 4 * H),
                            jnp.arange(2 * H, 3 * H)])
    wih_p = wih[perm]                         # (4H, D)
    whh_p = whh[perm]                         # (4H, H)
    b_p = (bih + bhh)[perm]                   # (4H,)  folded biases

    # Hoist the input projection + bias out of the recurrence: one large matmul in
    # XLA, produced directly time-major (T, B, 4H) so no extra transpose pass and no
    # per-step broadcast of the bias inside the kernel.
    gates_in = (jnp.einsum('btd,gd->tbg', x, wih_p,
                           preferred_element_type=jnp.float32)
                + b_p.astype(jnp.float32))    # (T, B, 4H)

    return pl.pallas_call(
        bottleneck_kernel,
        out_shape=jax.ShapeDtypeStruct((B, L), jnp.float32),
        in_specs=[pl.BlockSpec(memory_space=pltpu.MemorySpace.VMEM)] * 4,
        out_specs=pl.BlockSpec(memory_space=pltpu.MemorySpace.VMEM),
    )(gates_in, whh_p.T, wlin.T, blin.reshape(1, L))


def bottleneck_reference(x, wih, whh, bih, bhh, wlin, blin):
    """Plain-JAX reference matching torch.nn.LSTM + Linear (eval mode)."""
    B, T, D = x.shape
    H = whh.shape[1]
    h = jnp.zeros((B, H), jnp.float32)
    c = jnp.zeros((B, H), jnp.float32)
    for t in range(T):
        gates = x[:, t, :] @ wih.T + h @ whh.T + bih + bhh
        i = jax.nn.sigmoid(gates[:, 0:H])
        f = jax.nn.sigmoid(gates[:, H:2 * H])
        g = jnp.tanh(gates[:, 2 * H:3 * H])
        o = jax.nn.sigmoid(gates[:, 3 * H:4 * H])
        c = f * c + i * g
        h = o * jnp.tanh(c)
    return h @ wlin.T + blin


if __name__ == "__main__":
    # Small shapes consistent with the module: Bottleneck(latent_size=128,
    # num_players=4, num_datapoints=32) -> D = 4*32 = 128, H = 128//4 = 32, L = 128.
    latent_size, num_players, num_datapoints = 128, 4, 32
    D = num_players * num_datapoints
    H = latent_size // 4
    L = latent_size
    B, T = 2, 8

    key = jax.random.PRNGKey(0)
    kx, k1, k2, k3, k4, k5, k6 = jax.random.split(key, 7)

    x = jax.random.normal(kx, (B, T, D), dtype=jnp.float32)

    # Deterministic parameter init (PyTorch LSTM-style uniform(-1/sqrt(H), 1/sqrt(H))).
    s = 1.0 / jnp.sqrt(jnp.float32(H))
    wih = jax.random.uniform(k1, (4 * H, D), jnp.float32, -s, s)   # weight_ih_l0
    whh = jax.random.uniform(k2, (4 * H, H), jnp.float32, -s, s)   # weight_hh_l0
    bih = jax.random.uniform(k3, (4 * H,), jnp.float32, -s, s)     # bias_ih_l0
    bhh = jax.random.uniform(k4, (4 * H,), jnp.float32, -s, s)     # bias_hh_l0
    wlin = jax.random.uniform(k5, (L, H), jnp.float32, -s, s)      # linear.weight
    blin = jax.random.uniform(k6, (L,), jnp.float32, -s, s)        # linear.bias

    out = bottleneck_forward(x, wih, whh, bih, bhh, wlin, blin)
    out = jax.block_until_ready(out)

    ref = bottleneck_reference(x, wih, whh, bih, bhh, wlin, blin)
    assert out.shape == (B, L), out.shape
    assert jnp.allclose(out, ref, atol=1e-5, rtol=1e-5), float(jnp.max(jnp.abs(out - ref)))

    print("KERNEL_OK")
</pallas_src>

<mosaic_0001>
module attributes {stable_mosaic.version = 11 : i64} {
  func.func @bottleneck_kernel(%arg0: memref<8x2x128xf32, #tpu.memory_space<vmem>>, %arg1: memref<32x128xf32, #tpu.memory_space<vmem>>, %arg2: memref<32x128xf32, #tpu.memory_space<vmem>>, %arg3: memref<1x128xf32, #tpu.memory_space<vmem>>, %arg4: memref<2x128xf32, #tpu.memory_space<vmem>>) attributes {dimension_semantics = [], scalar_prefetch = 0 : i64, scratch_operands = 0 : i64, tpu.core_type = #tpu.core_type<tc>} {
    %c0 = arith.constant 0 : index
    %c0_0 = arith.constant 0 : index
    %c0_1 = arith.constant 0 : index
    %0 = vector.load %arg0[%c0, %c0_0, %c0_1] : memref<8x2x128xf32, #tpu.memory_space<vmem>>, vector<1x2x128xf32>
    %1 = vector.shape_cast %0 : vector<1x2x128xf32> to vector<2x128xf32>
    %2 = vector.extract_strided_slice %1 {offsets = [0, 0], sizes = [2, 96], strides = [1, 1]} : vector<2x128xf32> to vector<2x96xf32>
    %3 = arith.negf %2 : vector<2x96xf32>
    %4 = math.exp %3 : vector<2x96xf32>
    %cst = arith.constant 1.000000e+00 : f32
    %5 = vector.broadcast %cst : f32 to vector<2x96xf32>
    %6 = arith.addf %5, %4 : vector<2x96xf32>
    %7 = arith.divf %5, %6 : vector<2x96xf32>
    %8 = vector.extract_strided_slice %1 {offsets = [0, 96], sizes = [2, 32], strides = [1, 1]} : vector<2x128xf32> to vector<2x32xf32>
    %9 = math.tanh %8 : vector<2x32xf32>
    %10 = vector.extract_strided_slice %7 {offsets = [0, 0], sizes = [2, 32], strides = [1, 1]} : vector<2x96xf32> to vector<2x32xf32>
    %11 = vector.extract_strided_slice %7 {offsets = [0, 64], sizes = [2, 32], strides = [1, 1]} : vector<2x96xf32> to vector<2x32xf32>
    %12 = arith.mulf %10, %9 : vector<2x32xf32>
    %13 = math.tanh %12 : vector<2x32xf32>
    %14 = arith.mulf %11, %13 : vector<2x32xf32>
    %c1 = arith.constant 1 : index
    %c0_2 = arith.constant 0 : index
    %c0_3 = arith.constant 0 : index
    %15 = vector.load %arg0[%c1, %c0_2, %c0_3] : memref<8x2x128xf32, #tpu.memory_space<vmem>>, vector<1x2x128xf32>
    %16 = vector.shape_cast %15 : vector<1x2x128xf32> to vector<2x128xf32>
    %c0_4 = arith.constant 0 : index
    %c0_5 = arith.constant 0 : index
    %17 = vector.load %arg1[%c0_4, %c0_5] : memref<32x128xf32, #tpu.memory_space<vmem>>, vector<32x128xf32>
    %cst_6 = arith.constant dense<0.000000e+00> : vector<2x128xf32>
    %18 = tpu.matmul %14, %17, %cst_6 {dimension_numbers = #tpu.dot_dimension_numbers<[1], [0], [0], [1], [0, 0, 1, 1], [], []>} : vector<2x32xf32>, vector<32x128xf32>, vector<2x128xf32> -> vector<2x128xf32>
    %19 = arith.addf %16, %18 : vector<2x128xf32>
    %20 = vector.extract_strided_slice %19 {offsets = [0, 0], sizes = [2, 96], strides = [1, 1]} : vector<2x128xf32> to vector<2x96xf32>
    %21 = arith.negf %20 : vector<2x96xf32>
    %22 = math.exp %21 : vector<2x96xf32>
    %cst_7 = arith.constant 1.000000e+00 : f32
    %23 = vector.broadcast %cst_7 : f32 to vector<2x96xf32>
    %24 = arith.addf %23, %22 : vector<2x96xf32>
    %25 = arith.divf %23, %24 : vector<2x96xf32>
    %26 = vector.extract_strided_slice %19 {offsets = [0, 96], sizes = [2, 32], strides = [1, 1]} : vector<2x128xf32> to vector<2x32xf32>
    %27 = math.tanh %26 : vector<2x32xf32>
    %28 = vector.extract_strided_slice %25 {offsets = [0, 0], sizes = [2, 32], strides = [1, 1]} : vector<2x96xf32> to vector<2x32xf32>
    %29 = vector.extract_strided_slice %25 {offsets = [0, 32], sizes = [2, 32], strides = [1, 1]} : vector<2x96xf32> to vector<2x32xf32>
    %30 = vector.extract_strided_slice %25 {offsets = [0, 64], sizes = [2, 32], strides = [1, 1]} : vector<2x96xf32> to vector<2x32xf32>
    %31 = arith.mulf %29, %12 : vector<2x32xf32>
    %32 = arith.mulf %28, %27 : vector<2x32xf32>
    %33 = arith.addf %31, %32 : vector<2x32xf32>
    %34 = math.tanh %33 : vector<2x32xf32>
    %35 = arith.mulf %30, %34 : vector<2x32xf32>
    %c2 = arith.constant 2 : index
    %c0_8 = arith.constant 0 : index
    %c0_9 = arith.constant 0 : index
    %36 = vector.load %arg0[%c2, %c0_8, %c0_9] : memref<8x2x128xf32, #tpu.memory_space<vmem>>, vector<1x2x128xf32>
    %37 = vector.shape_cast %36 : vector<1x2x128xf32> to vector<2x128xf32>
    %c0_10 = arith.constant 0 : index
    %c0_11 = arith.constant 0 : index
    %38 = vector.load %arg1[%c0_10, %c0_11] : memref<32x128xf32, #tpu.memory_space<vmem>>, vector<32x128xf32>
    %cst_12 = arith.constant dense<0.000000e+00> : vector<2x128xf32>
    %39 = tpu.matmul %35, %38, %cst_12 {dimension_numbers = #tpu.dot_dimension_numbers<[1], [0], [0], [1], [0, 0, 1, 1], [], []>} : vector<2x32xf32>, vector<32x128xf32>, vector<2x128xf32> -> vector<2x128xf32>
    %40 = arith.addf %37, %39 : vector<2x128xf32>
    %41 = vector.extract_strided_slice %40 {offsets = [0, 0], sizes = [2, 96], strides = [1, 1]} : vector<2x128xf32> to vector<2x96xf32>
    %42 = arith.negf %41 : vector<2x96xf32>
    %43 = math.exp %42 : vector<2x96xf32>
    %cst_13 = arith.constant 1.000000e+00 : f32
    %44 = vector.broadcast %cst_13 : f32 to vector<2x96xf32>
    %45 = arith.addf %44, %43 : vector<2x96xf32>
    %46 = arith.divf %44, %45 : vector<2x96xf32>
    %47 = vector.extract_strided_slice %40 {offsets = [0, 96], sizes = [2, 32], strides = [1, 1]} : vector<2x128xf32> to vector<2x32xf32>
    %48 = math.tanh %47 : vector<2x32xf32>
    %49 = vector.extract_strided_slice %46 {offsets = [0, 0], sizes = [2, 32], strides = [1, 1]} : vector<2x96xf32> to vector<2x32xf32>
    %50 = vector.extract_strided_slice %46 {offsets = [0, 32], sizes = [2, 32], strides = [1, 1]} : vector<2x96xf32> to vector<2x32xf32>
    %51 = vector.extract_strided_slice %46 {offsets = [0, 64], sizes = [2, 32], strides = [1, 1]} : vector<2x96xf32> to vector<2x32xf32>
    %52 = arith.mulf %50, %33 : vector<2x32xf32>
    %53 = arith.mulf %49, %48 : vector<2x32xf32>
    %54 = arith.addf %52, %53 : vector<2x32xf32>
    %55 = math.tanh %54 : vector<2x32xf32>
    %56 = arith.mulf %51, %55 : vector<2x32xf32>
    %c3 = arith.constant 3 : index
    %c0_14 = arith.constant 0 : index
    %c0_15 = arith.constant 0 : index
    %57 = vector.load %arg0[%c3, %c0_14, %c0_15] : memref<8x2x128xf32, #tpu.memory_space<vmem>>, vector<1x2x128xf32>
    %58 = vector.shape_cast %57 : vector<1x2x128xf32> to vector<2x128xf32>
    %c0_16 = arith.constant 0 : index
    %c0_17 = arith.constant 0 : index
    %59 = vector.load %arg1[%c0_16, %c0_17] : memref<32x128xf32, #tpu.memory_space<vmem>>, vector<32x128xf32>
    %cst_18 = arith.constant dense<0.000000e+00> : vector<2x128xf32>
    %60 = tpu.matmul %56, %59, %cst_18 {dimension_numbers = #tpu.dot_dimension_numbers<[1], [0], [0], [1], [0, 0, 1, 1], [], []>} : vector<2x32xf32>, vector<32x128xf32>, vector<2x128xf32> -> vector<2x128xf32>
    %61 = arith.addf %58, %60 : vector<2x128xf32>
    %62 = vector.extract_strided_slice %61 {offsets = [0, 0], sizes = [2, 96], strides = [1, 1]} : vector<2x128xf32> to vector<2x96xf32>
    %63 = arith.negf %62 : vector<2x96xf32>
    %64 = math.exp %63 : vector<2x96xf32>
    %cst_19 = arith.constant 1.000000e+00 : f32
    %65 = vector.broadcast %cst_19 : f32 to vector<2x96xf32>
    %66 = arith.addf %65, %64 : vector<2x96xf32>
    %67 = arith.divf %65, %66 : vector<2x96xf32>
    %68 = vector.extract_strided_slice %61 {offsets = [0, 96], sizes = [2, 32], strides = [1, 1]} : vector<2x128xf32> to vector<2x32xf32>
    %69 = math.tanh %68 : vector<2x32xf32>
    %70 = vector.extract_strided_slice %67 {offsets = [0, 0], sizes = [2, 32], strides = [1, 1]} : vector<2x96xf32> to vector<2x32xf32>
    %71 = vector.extract_strided_slice %67 {offsets = [0, 32], sizes = [2, 32], strides = [1, 1]} : vector<2x96xf32> to vector<2x32xf32>
    %72 = vector.extract_strided_slice %67 {offsets = [0, 64], sizes = [2, 32], strides = [1, 1]} : vector<2x96xf32> to vector<2x32xf32>
    %73 = arith.mulf %71, %54 : vector<2x32xf32>
    %74 = arith.mulf %70, %69 : vector<2x32xf32>
    %75 = arith.addf %73, %74 : vector<2x32xf32>
    %76 = math.tanh %75 : vector<2x32xf32>
    %77 = arith.mulf %72, %76 : vector<2x32xf32>
    %c4 = arith.constant 4 : index
    %c0_20 = arith.constant 0 : index
    %c0_21 = arith.constant 0 : index
    %78 = vector.load %arg0[%c4, %c0_20, %c0_21] : memref<8x2x128xf32, #tpu.memory_space<vmem>>, vector<1x2x128xf32>
    %79 = vector.shape_cast %78 : vector<1x2x128xf32> to vector<2x128xf32>
    %c0_22 = arith.constant 0 : index
    %c0_23 = arith.constant 0 : index
    %80 = vector.load %arg1[%c0_22, %c0_23] : memref<32x128xf32, #tpu.memory_space<vmem>>, vector<32x128xf32>
    %cst_24 = arith.constant dense<0.000000e+00> : vector<2x128xf32>
    %81 = tpu.matmul %77, %80, %cst_24 {dimension_numbers = #tpu.dot_dimension_numbers<[1], [0], [0], [1], [0, 0, 1, 1], [], []>} : vector<2x32xf32>, vector<32x128xf32>, vector<2x128xf32> -> vector<2x128xf32>
    %82 = arith.addf %79, %81 : vector<2x128xf32>
    %83 = vector.extract_strided_slice %82 {offsets = [0, 0], sizes = [2, 96], strides = [1, 1]} : vector<2x128xf32> to vector<2x96xf32>
    %84 = arith.negf %83 : vector<2x96xf32>
    %85 = math.exp %84 : vector<2x96xf32>
    %cst_25 = arith.constant 1.000000e+00 : f32
    %86 = vector.broadcast %cst_25 : f32 to vector<2x96xf32>
    %87 = arith.addf %86, %85 : vector<2x96xf32>
    %88 = arith.divf %86, %87 : vector<2x96xf32>
    %89 = vector.extract_strided_slice %82 {offsets = [0, 96], sizes = [2, 32], strides = [1, 1]} : vector<2x128xf32> to vector<2x32xf32>
    %90 = math.tanh %89 : vector<2x32xf32>
    %91 = vector.extract_strided_slice %88 {offsets = [0, 0], sizes = [2, 32], strides = [1, 1]} : vector<2x96xf32> to vector<2x32xf32>
    %92 = vector.extract_strided_slice %88 {offsets = [0, 32], sizes = [2, 32], strides = [1, 1]} : vector<2x96xf32> to vector<2x32xf32>
    %93 = vector.extract_strided_slice %88 {offsets = [0, 64], sizes = [2, 32], strides = [1, 1]} : vector<2x96xf32> to vector<2x32xf32>
    %94 = arith.mulf %92, %75 : vector<2x32xf32>
    %95 = arith.mulf %91, %90 : vector<2x32xf32>
    %96 = arith.addf %94, %95 : vector<2x32xf32>
    %97 = math.tanh %96 : vector<2x32xf32>
    %98 = arith.mulf %93, %97 : vector<2x32xf32>
    %c5 = arith.constant 5 : index
    %c0_26 = arith.constant 0 : index
    %c0_27 = arith.constant 0 : index
    %99 = vector.load %arg0[%c5, %c0_26, %c0_27] : memref<8x2x128xf32, #tpu.memory_space<vmem>>, vector<1x2x128xf32>
    %100 = vector.shape_cast %99 : vector<1x2x128xf32> to vector<2x128xf32>
    %c0_28 = arith.constant 0 : index
    %c0_29 = arith.constant 0 : index
    %101 = vector.load %arg1[%c0_28, %c0_29] : memref<32x128xf32, #tpu.memory_space<vmem>>, vector<32x128xf32>
    %cst_30 = arith.constant dense<0.000000e+00> : vector<2x128xf32>
    %102 = tpu.matmul %98, %101, %cst_30 {dimension_numbers = #tpu.dot_dimension_numbers<[1], [0], [0], [1], [0, 0, 1, 1], [], []>} : vector<2x32xf32>, vector<32x128xf32>, vector<2x128xf32> -> vector<2x128xf32>
    %103 = arith.addf %100, %102 : vector<2x128xf32>
    %104 = vector.extract_strided_slice %103 {offsets = [0, 0], sizes = [2, 96], strides = [1, 1]} : vector<2x128xf32> to vector<2x96xf32>
    %105 = arith.negf %104 : vector<2x96xf32>
    %106 = math.exp %105 : vector<2x96xf32>
    %cst_31 = arith.constant 1.000000e+00 : f32
    %107 = vector.broadcast %cst_31 : f32 to vector<2x96xf32>
    %108 = arith.addf %107, %106 : vector<2x96xf32>
    %109 = arith.divf %107, %108 : vector<2x96xf32>
    %110 = vector.extract_strided_slice %103 {offsets = [0, 96], sizes = [2, 32], strides = [1, 1]} : vector<2x128xf32> to vector<2x32xf32>
    %111 = math.tanh %110 : vector<2x32xf32>
    %112 = vector.extract_strided_slice %109 {offsets = [0, 0], sizes = [2, 32], strides = [1, 1]} : vector<2x96xf32> to vector<2x32xf32>
    %113 = vector.extract_strided_slice %109 {offsets = [0, 32], sizes = [2, 32], strides = [1, 1]} : vector<2x96xf32> to vector<2x32xf32>
    %114 = vector.extract_strided_slice %109 {offsets = [0, 64], sizes = [2, 32], strides = [1, 1]} : vector<2x96xf32> to vector<2x32xf32>
    %115 = arith.mulf %113, %96 : vector<2x32xf32>
    %116 = arith.mulf %112, %111 : vector<2x32xf32>
    %117 = arith.addf %115, %116 : vector<2x32xf32>
    %118 = math.tanh %117 : vector<2x32xf32>
    %119 = arith.mulf %114, %118 : vector<2x32xf32>
    %c6 = arith.constant 6 : index
    %c0_32 = arith.constant 0 : index
    %c0_33 = arith.constant 0 : index
    %120 = vector.load %arg0[%c6, %c0_32, %c0_33] : memref<8x2x128xf32, #tpu.memory_space<vmem>>, vector<1x2x128xf32>
    %121 = vector.shape_cast %120 : vector<1x2x128xf32> to vector<2x128xf32>
    %c0_34 = arith.constant 0 : index
    %c0_35 = arith.constant 0 : index
    %122 = vector.load %arg1[%c0_34, %c0_35] : memref<32x128xf32, #tpu.memory_space<vmem>>, vector<32x128xf32>
    %cst_36 = arith.constant dense<0.000000e+00> : vector<2x128xf32>
    %123 = tpu.matmul %119, %122, %cst_36 {dimension_numbers = #tpu.dot_dimension_numbers<[1], [0], [0], [1], [0, 0, 1, 1], [], []>} : vector<2x32xf32>, vector<32x128xf32>, vector<2x128xf32> -> vector<2x128xf32>
    %124 = arith.addf %121, %123 : vector<2x128xf32>
    %125 = vector.extract_strided_slice %124 {offsets = [0, 0], sizes = [2, 96], strides = [1, 1]} : vector<2x128xf32> to vector<2x96xf32>
    %126 = arith.negf %125 : vector<2x96xf32>
    %127 = math.exp %126 : vector<2x96xf32>
    %cst_37 = arith.constant 1.000000e+00 : f32
    %128 = vector.broadcast %cst_37 : f32 to vector<2x96xf32>
    %129 = arith.addf %128, %127 : vector<2x96xf32>
    %130 = arith.divf %128, %129 : vector<2x96xf32>
    %131 = vector.extract_strided_slice %124 {offsets = [0, 96], sizes = [2, 32], strides = [1, 1]} : vector<2x128xf32> to vector<2x32xf32>
    %132 = math.tanh %131 : vector<2x32xf32>
    %133 = vector.extract_strided_slice %130 {offsets = [0, 0], sizes = [2, 32], strides = [1, 1]} : vector<2x96xf32> to vector<2x32xf32>
    %134 = vector.extract_strided_slice %130 {offsets = [0, 32], sizes = [2, 32], strides = [1, 1]} : vector<2x96xf32> to vector<2x32xf32>
    %135 = vector.extract_strided_slice %130 {offsets = [0, 64], sizes = [2, 32], strides = [1, 1]} : vector<2x96xf32> to vector<2x32xf32>
    %136 = arith.mulf %134, %117 : vector<2x32xf32>
    %137 = arith.mulf %133, %132 : vector<2x32xf32>
    %138 = arith.addf %136, %137 : vector<2x32xf32>
    %139 = math.tanh %138 : vector<2x32xf32>
    %140 = arith.mulf %135, %139 : vector<2x32xf32>
    %c7 = arith.constant 7 : index
    %c0_38 = arith.constant 0 : index
    %c0_39 = arith.constant 0 : index
    %141 = vector.load %arg0[%c7, %c0_38, %c0_39] : memref<8x2x128xf32, #tpu.memory_space<vmem>>, vector<1x2x128xf32>
    %142 = vector.shape_cast %141 : vector<1x2x128xf32> to vector<2x128xf32>
    %c0_40 = arith.constant 0 : index
    %c0_41 = arith.constant 0 : index
    %143 = vector.load %arg1[%c0_40, %c0_41] : memref<32x128xf32, #tpu.memory_space<vmem>>, vector<32x128xf32>
    %cst_42 = arith.constant dense<0.000000e+00> : vector<2x128xf32>
    %144 = tpu.matmul %140, %143, %cst_42 {dimension_numbers = #tpu.dot_dimension_numbers<[1], [0], [0], [1], [0, 0, 1, 1], [], []>} : vector<2x32xf32>, vector<32x128xf32>, vector<2x128xf32> -> vector<2x128xf32>
    %145 = arith.addf %142, %144 : vector<2x128xf32>
    %146 = vector.extract_strided_slice %145 {offsets = [0, 0], sizes = [2, 96], strides = [1, 1]} : vector<2x128xf32> to vector<2x96xf32>
    %147 = arith.negf %146 : vector<2x96xf32>
    %148 = math.exp %147 : vector<2x96xf32>
    %cst_43 = arith.constant 1.000000e+00 : f32
    %149 = vector.broadcast %cst_43 : f32 to vector<2x96xf32>
    %150 = arith.addf %149, %148 : vector<2x96xf32>
    %151 = arith.divf %149, %150 : vector<2x96xf32>
    %152 = vector.extract_strided_slice %145 {offsets = [0, 96], sizes = [2, 32], strides = [1, 1]} : vector<2x128xf32> to vector<2x32xf32>
    %153 = math.tanh %152 : vector<2x32xf32>
    %154 = vector.extract_strided_slice %151 {offsets = [0, 0], sizes = [2, 32], strides = [1, 1]} : vector<2x96xf32> to vector<2x32xf32>
    %155 = vector.extract_strided_slice %151 {offsets = [0, 32], sizes = [2, 32], strides = [1, 1]} : vector<2x96xf32> to vector<2x32xf32>
    %156 = vector.extract_strided_slice %151 {offsets = [0, 64], sizes = [2, 32], strides = [1, 1]} : vector<2x96xf32> to vector<2x32xf32>
    %157 = arith.mulf %155, %138 : vector<2x32xf32>
    %158 = arith.mulf %154, %153 : vector<2x32xf32>
    %159 = arith.addf %157, %158 : vector<2x32xf32>
    %160 = math.tanh %159 : vector<2x32xf32>
    %161 = arith.mulf %156, %160 : vector<2x32xf32>
    %c0_44 = arith.constant 0 : index
    %c0_45 = arith.constant 0 : index
    %162 = vector.load %arg2[%c0_44, %c0_45] : memref<32x128xf32, #tpu.memory_space<vmem>>, vector<32x128xf32>
    %cst_46 = arith.constant dense<0.000000e+00> : vector<2x128xf32>
    %163 = tpu.matmul %161, %162, %cst_46 {dimension_numbers = #tpu.dot_dimension_numbers<[1], [0], [0], [1], [0, 0, 1, 1], [], []>} : vector<2x32xf32>, vector<32x128xf32>, vector<2x128xf32> -> vector<2x128xf32>
    %c0_47 = arith.constant 0 : index
    %c0_48 = arith.constant 0 : index
    %164 = vector.load %arg3[%c0_47, %c0_48] : memref<1x128xf32, #tpu.memory_space<vmem>>, vector<1x128xf32>
    %165 = vector.broadcast %164 : vector<1x128xf32> to vector<2x128xf32>
    %166 = arith.addf %163, %165 : vector<2x128xf32>
    %c0_49 = arith.constant 0 : index
    %c0_50 = arith.constant 0 : index
    %167 = vector.load %arg4[%c0_49, %c0_50] : memref<2x128xf32, #tpu.memory_space<vmem>>, vector<2x128xf32>
    tpu.vector_store %arg4[%c0_49, %c0_50], %166 {strides = array<i32>} : memref<2x128xf32, #tpu.memory_space<vmem>>, vector<2x128xf32>,
    return
  }
}

</mosaic_0001>

<bundles_post_ra>
// kernel: tpu_custom_call.1
= control target key start
LH: loop header
LB: loop body
LE: loop exit
PB: predicated region body
PF: predicated region fallthrough
CT: control target
= control target key end

     0   :  { %9 = vsyncpa [#allocation3], 0  ;;  %s896_s0 = inlined_call_operand.hbm [shape: f32[8,2,128], index: 0, kind: input, shape index: {}]   ;;  %s897_s1 = inlined_call_operand.hbm [shape: f32[32,128], index: 1, kind: input, shape index: {}]   ;;  %s898_s2 = inlined_call_operand.hbm [shape: f32[32,128], index: 2, kind: input, shape index: {}]   ;;  %s899_s3 = inlined_call_operand.vmem [shape: f32[1,128], index: 3, kind: input, shape index: {}]   ;;  %s900_s4 = inlined_call_operand.hbm [shape: f32[2,128], index: 4, kind: output, shape index: {}]  }
   0x1   :  { %10 = vsyncpa [#allocation6], 0  ;;  %s29_s17 = sshll.u32 %s897_s1, 4  ;;  %s30_s17 = int_to_ptr.hbm [resolvable:$true] %s29_s17 }
   0x2   :  { %11 = vsyncpa [#allocation4], 0  ;;  %s805_s18 = smov [#allocation5]   ;;  %s16_s22 = sshll.u32 %s896_s0, 4  ;;  %s17_s22 = int_to_ptr.hbm [resolvable:$true] %s16_s22 }
   0x3   :  { %s31_s19 = sshll.u32 %s805_s18, 4  ;;  %s806_s23 = smov 128   ;;  %s32_s19 = int_to_ptr.vmem [resolvable:$true] %s31_s19 }
   0x4   :  { %s807_s24 = smov 8   ;;  %s808_s25 = smov [#allocation2]  }
   0x5   :  { %37 = dma.hbm_to_vmem [thread:$0]  %s30_s17, 512, %s32_s19, [#allocation6], %s806_s23, %s806_s23, %s807_s24  }
   0x6   :  { %s18_s26 = sshll.u32 %s808_s25, 4  ;;  %s809_s27 = smov 32   ;;  %s19_s26 = int_to_ptr.vmem [resolvable:$true] %s18_s26 }
   0x7   :  { %s810_s28 = smov 2   ;;  %s42_s30 = sshll.u32 %s898_s2, 4  ;;  %s43_s30 = int_to_ptr.hbm [resolvable:$true] %s42_s30 }
   0x8   :  { %24 = dma.hbm_to_vmem [thread:$0]  %s17_s22, 256, %s19_s26, [#allocation3], %s809_s27, %s809_s27, %s810_s28  }
   0x9   :  { %s811_s5 = smov [#allocation7]  }
   0xa   :  { %s44_s6 = sshll.u32 %s811_s5, 4  ;;  %s45_s6 = int_to_ptr.vmem [resolvable:$true] %s44_s6 }
   0xb   :  { %50 = dma.hbm_to_vmem [thread:$0]  %s43_s30, 512, %s45_s6, [#allocation6], %s806_s23, %s806_s23, %s807_s24  }
   0xc   :  { %799 = dma.done.wait [#allocation3], 256  }
   0xd   :  { %800 = vsyncadd [#allocation3], 4294967040 }
   0xe   :  { %801 = dma.done.wait [#allocation6], 1024  }
   0xf   :  { %802 = vsyncadd [#allocation6], 4294966272  ;;  %v65_v0 = vld [vmem:[#allocation2] sm:$0x3]  ;;  %s812_s0 = smov 64   ;;  %v102_v18 = vld [vmem:[#allocation5 + $0x18] sm:$0xff] }
  0x10   :  { %639 = vtanh.f32 %v65_v0  ;;  %v613_v2 = vmul.f32 -1.442695, %v65_v0  ;;  %v101_v19 = vld [vmem:[#allocation5 + $0x10] sm:$0xff]  ;;  %121 = vmatpush.msra.mxu0 %v102_v18  ;;  %190 = vmatpush.msra.mxu1 %v102_v18  ;;  %v100_v20 = vld [vmem:[#allocation5 + $0x8] sm:$0xff]  ;;  %v99_v21 = vld [vmem:[#allocation5] sm:$0xff]  ;;  %vm106_vm4 = vcmask 261120  }
  0x11   :  { %255 = vmatpush.msra.mxu2 %v102_v18  ;;  %320 = vmatpush.msra.mxu3 %v102_v18  ;;  %v98_v25 = vld [vmem:[#allocation2 + $0x2] sm:$0x3]  ;;  %v172_v52 = vld [vmem:[#allocation2 + $0x4] sm:$0x3]  ;;  %s813_s8 = smov [#allocation8]   ;;  %s602_s12 = sshll.u32 %s900_s4, 4  ;;  %s603_s12 = int_to_ptr.hbm [resolvable:$true] %s602_s12 }
  0x12   :  { %641 = vpow2.f32 %v613_v2  ;;  %122 = vmatpush.msra.mxu0 %v101_v19  ;;  %191 = vmatpush.msra.mxu1 %v101_v19  ;;  %s600_s9 = sshll.u32 %s813_s8, 4  ;;  %s601_s9 = int_to_ptr.vmem [resolvable:$true] %s600_s9 }
  0x13   :  { %256 = vmatpush.msra.mxu2 %v101_v19  ;;  %321 = vmatpush.msra.mxu3 %v101_v19 }
  0x14   :  { %123 = vmatpush.msra.mxu0 %v100_v20  ;;  %192 = vmatpush.msra.mxu1 %v100_v20 }
  0x15   :  { %257 = vmatpush.msra.mxu2 %v100_v20  ;;  %322 = vmatpush.msra.mxu3 %v100_v20 }
  0x16   :  { %v640_v1 = vpop.eup %639  ;;  %124 = vmatpush.msra.mxu0 %v99_v21  ;;  %193 = vmatpush.msra.mxu1 %v99_v21 }
  0x17   :  { %87 = vrot.lane.b32.xlu0 %v640_v1, %s809_s27  ;;  %258 = vmatpush.msra.mxu2 %v99_v21 }
  0x18   :  { %v642_v3 = vpop.eup %641  ;;  %323 = vmatpush.msra.mxu3 %v99_v21  ;;  %385 = vmatpush.msrb.mxu0 %v102_v18 }
  0x19   :  { %v69_v4 = vadd.f32 1.0, %v642_v3  ;;  %450 = vmatpush.msrb.mxu1 %v102_v18  ;;  %515 = vmatpush.msrb.mxu2 %v102_v18 }
  0x1a   :  { %386 = vmatpush.msrb.mxu0 %v101_v19 }
  0x1b   :  { %643 = vrcp.f32 %v69_v4  ;;  %vm75_vm0 = vweird.f32 %v69_v4  ;;  %v81_v9 = vand.u32 2147483648, %v69_v4  ;;  %v79_v11 = vand.u32 2147483647, %v69_v4  ;;  %451 = vmatpush.msrb.mxu1 %v101_v19  ;;  %516 = vmatpush.msrb.mxu2 %v101_v19 }
  0x1c   :  { %387 = vmatpush.msrb.mxu0 %v100_v20 }
  0x1d   :  { %v82_v12 = vor.u32 1.1754944e-38, %v81_v9  ;;  %vm80_vm3 = vcmp.eq.f32.partialorder %v79_v11, 8.507059e+37  ;;  %452 = vmatpush.msrb.mxu1 %v100_v20  ;;  %517 = vmatpush.msrb.mxu2 %v100_v20 }
  0x1e   :  { %388 = vmatpush.msrb.mxu0 %v99_v21 }
  0x1f   :  { %453 = vmatpush.msrb.mxu1 %v99_v21  ;;  %518 = vmatpush.msrb.mxu2 %v99_v21 }
  0x21   :  { %v644_v5 = vpop.eup %643 }
  0x22   :  { %v71_v6 = vmul.f32 %v644_v5, %v69_v4  ;;  %vm76_vm1 = vweird.f32 %v644_v5 }
  0x23   :  { %vm77_vm2 = vmor %vm75_vm0, %vm76_vm1 }
  0x24   :  { %v72_v7 = vsub.f32 1.0, %v71_v6 }
  0x26   :  { %v73_v8 = vmul.f32 %v644_v5, %v72_v7 }
  0x28   :  { %v74_v10 = vadd.f32 %v644_v5, %v73_v8 }
  0x2a   :  { %v78_v13 = vsel %vm77_vm2, %v644_v5, %v74_v10 }
  0x2b   :  { %v83_v14 = vsel %vm80_vm3, %v82_v12, %v78_v13 }
  0x89   :  { %v88_v15 = vpop.permute.xlu0 %87 }
  0x8a   :  { %v90_v16 = vmul.f32 %v88_v15, %v83_v14 }
  0x8c   :  { %645 = vtanh.f32 %v90_v16  ;;  %151 = vrot.lane.b32.xlu2 %v90_v16, %s809_s27 }
  0x92   :  { %v646_v17 = vpop.eup %645 }
  0x93   :  { %93 = vrot.lane.b32.xlu0 %v646_v17, %s812_s0 }
  0xe6   :  { %v152_v44 = vpop.permute.xlu2 %151 }
 0x105   :  { %v94_v22 = vpop.permute.xlu0 %93 }
 0x106   :  { %v96_v23 = vmul.f32 %v94_v22, %v83_v14  ;;  %v237_v14 = vld [vmem:[#allocation2 + $0x6] sm:$0x3] }
 0x108   :  { %104 = vrot.lane.b32.xlu1 %v96_v23, %s812_s0 }
 0x17a   :  { %v105_v24 = vpop.permute.xlu1 %104 }
 0x17b   :  { %614 = vmatmul.msk.f32.vlgmr.msra.gmra.mxu0 %vm106_vm4, %v105_v24 }
 0x1f8   :  { %v126_v26 = vpop.f32.mrf.mxu0 }
 0x1f9   :  { %v129_v27 = vadd.f32 %v126_v26, %v98_v25 }
 0x1fb   :  { %647 = vtanh.f32 %v129_v27  ;;  %v615_v29 = vmul.f32 -1.442695, %v129_v27 }
 0x1fd   :  { %649 = vpow2.f32 %v615_v29 }
 0x201   :  { %v648_v28 = vpop.eup %647 }
 0x202   :  { %156 = vrot.lane.b32.xlu1 %v648_v28, %s809_s27 }
 0x203   :  { %v650_v30 = vpop.eup %649 }
 0x204   :  { %v133_v31 = vadd.f32 1.0, %v650_v30 }
 0x206   :  { %651 = vrcp.f32 %v133_v31  ;;  %v145_v37 = vand.u32 2147483648, %v133_v31  ;;  %vm139_vm6 = vweird.f32 %v133_v31  ;;  %v143_v38 = vand.u32 2147483647, %v133_v31 }
 0x208   :  { %v146_v40 = vor.u32 1.1754944e-38, %v145_v37  ;;  %vm144_vm8 = vcmp.eq.f32.partialorder %v143_v38, 8.507059e+37 }
 0x20c   :  { %v652_v32 = vpop.eup %651 }
 0x20d   :  { %v135_v33 = vmul.f32 %v652_v32, %v133_v31  ;;  %vm140_vm5 = vweird.f32 %v652_v32 }
 0x20e   :  { %vm141_vm7 = vmor %vm139_vm6, %vm140_vm5 }
 0x20f   :  { %v136_v34 = vsub.f32 1.0, %v135_v33 }
 0x211   :  { %v137_v35 = vmul.f32 %v652_v32, %v136_v34 }
 0x213   :  { %v138_v36 = vadd.f32 %v652_v32, %v137_v35 }
 0x215   :  { %v142_v39 = vsel %vm141_vm7, %v652_v32, %v138_v36 }
 0x216   :  { %v147_v42 = vsel %vm144_vm8, %v146_v40, %v142_v39  ;;  %v302_v40 = vld [vmem:[#allocation2 + $0x8] sm:$0x3] }
 0x217   :  { %v154_v45 = vmul.f32 %v152_v44, %v147_v42 }
 0x274   :  { %v157_v41 = vpop.permute.xlu1 %156 }
 0x275   :  { %v159_v43 = vmul.f32 %v157_v41, %v147_v42 }
 0x277   :  { %161 = vrot.lane.b32.xlu2 %v159_v43, %s809_s27 }
 0x2d1   :  { %v162_v46 = vpop.permute.xlu2 %161 }
 0x2d2   :  { %v164_v47 = vadd.f32 %v162_v46, %v154_v45 }
 0x2d4   :  { %653 = vtanh.f32 %v164_v47 }
 0x2da   :  { %v654_v48 = vpop.eup %653 }
 0x2db   :  { %167 = vrot.lane.b32.xlu0 %v654_v48, %s809_s27 }
 0x34d   :  { %v168_v49 = vpop.permute.xlu0 %167 }
 0x34e   :  { %v170_v50 = vmul.f32 %v168_v49, %v147_v42 }
 0x350   :  { %174 = vrot.lane.b32.xlu1 %v170_v50, %s812_s0 }
 0x3c2   :  { %v175_v51 = vpop.permute.xlu1 %174 }
 0x3c3   :  { %616 = vmatmul.msk.f32.vlgmr.msra.gmra.mxu1 %vm106_vm4, %v175_v51 }
 0x440   :  { %v195_v53 = vpop.f32.mrf.mxu1 }
 0x441   :  { %v198_v54 = vadd.f32 %v195_v53, %v172_v52 }
 0x443   :  { %655 = vtanh.f32 %v198_v54  ;;  %v617_v56 = vmul.f32 -1.442695, %v198_v54 }
 0x445   :  { %657 = vpow2.f32 %v617_v56 }
 0x449   :  { %v656_v55 = vpop.eup %655 }
 0x44a   :  { %221 = vrot.lane.b32.xlu2 %v656_v55, %s809_s27 }
 0x44b   :  { %v658_v57 = vpop.eup %657 }
 0x44c   :  { %v202_v58 = vadd.f32 1.0, %v658_v57 }
 0x44e   :  { %659 = vrcp.f32 %v202_v58  ;;  %v214_v0 = vand.u32 2147483648, %v202_v58  ;;  %vm208_vm10 = vweird.f32 %v202_v58  ;;  %v212_v1 = vand.u32 2147483647, %v202_v58 }
 0x450   :  { %v215_v3 = vor.u32 1.1754944e-38, %v214_v0  ;;  %vm213_vm12 = vcmp.eq.f32.partialorder %v212_v1, 8.507059e+37 }
 0x454   :  { %v660_v59 = vpop.eup %659 }
 0x455   :  { %v204_v60 = vmul.f32 %v660_v59, %v202_v58  ;;  %vm209_vm9 = vweird.f32 %v660_v59 }
 0x456   :  { %vm210_vm11 = vmor %vm208_vm10, %vm209_vm9 }
 0x457   :  { %v205_v61 = vsub.f32 1.0, %v204_v60 }
 0x459   :  { %v206_v62 = vmul.f32 %v660_v59, %v205_v61 }
 0x45b   :  { %v207_v63 = vadd.f32 %v660_v59, %v206_v62 }
 0x45d   :  { %v211_v2 = vsel %vm210_vm11, %v660_v59, %v207_v63 }
 0x45e   :  { %v216_v5 = vsel %vm213_vm12, %v215_v3, %v211_v2  ;;  %v367_v2 = vld [vmem:[#allocation2 + $0xa] sm:$0x3] }
 0x45f   :  { %v219_v7 = vmul.f32 %v216_v5, %v164_v47 }
 0x4a4   :  { %v222_v4 = vpop.permute.xlu2 %221 }
 0x4a5   :  { %v224_v6 = vmul.f32 %v222_v4, %v216_v5 }
 0x4a7   :  { %226 = vrot.lane.b32.xlu0 %v224_v6, %s809_s27 }
 0x519   :  { %v227_v8 = vpop.permute.xlu0 %226 }
 0x51a   :  { %v229_v9 = vadd.f32 %v227_v8, %v219_v7 }
 0x51c   :  { %661 = vtanh.f32 %v229_v9 }
 0x522   :  { %v662_v10 = vpop.eup %661 }
 0x523   :  { %232 = vrot.lane.b32.xlu1 %v662_v10, %s809_s27 }
 0x595   :  { %v233_v11 = vpop.permute.xlu1 %232 }
 0x596   :  { %v235_v12 = vmul.f32 %v233_v11, %v216_v5 }
 0x598   :  { %239 = vrot.lane.b32.xlu2 %v235_v12, %s812_s0 }
 0x5f2   :  { %v240_v13 = vpop.permute.xlu2 %239 }
 0x5f3   :  { %618 = vmatmul.msk.f32.vlgmr.msra.gmra.mxu2 %vm106_vm4, %v240_v13 }
 0x676   :  { %v260_v15 = vpop.f32.mrf.mxu2 }
 0x677   :  { %v263_v16 = vadd.f32 %v260_v15, %v237_v14 }
 0x679   :  { %663 = vtanh.f32 %v263_v16  ;;  %v619_v18 = vmul.f32 -1.442695, %v263_v16 }
 0x67b   :  { %665 = vpow2.f32 %v619_v18 }
 0x67f   :  { %v664_v17 = vpop.eup %663 }
 0x680   :  { %286 = vrot.lane.b32.xlu0 %v664_v17, %s809_s27 }
 0x681   :  { %v666_v19 = vpop.eup %665 }
 0x682   :  { %v267_v20 = vadd.f32 1.0, %v666_v19 }
 0x684   :  { %667 = vrcp.f32 %v267_v20  ;;  %v279_v26 = vand.u32 2147483648, %v267_v20  ;;  %vm273_vm14 = vweird.f32 %v267_v20  ;;  %v277_v27 = vand.u32 2147483647, %v267_v20 }
 0x686   :  { %v280_v29 = vor.u32 1.1754944e-38, %v279_v26  ;;  %vm278_vm0 = vcmp.eq.f32.partialorder %v277_v27, 8.507059e+37 }
 0x68a   :  { %v668_v21 = vpop.eup %667 }
 0x68b   :  { %v269_v22 = vmul.f32 %v668_v21, %v267_v20  ;;  %vm274_vm13 = vweird.f32 %v668_v21 }
 0x68c   :  { %vm275_vm15 = vmor %vm273_vm14, %vm274_vm13 }
 0x68d   :  { %v270_v23 = vsub.f32 1.0, %v269_v22 }
 0x68f   :  { %v271_v24 = vmul.f32 %v668_v21, %v270_v23 }
 0x691   :  { %v272_v25 = vadd.f32 %v668_v21, %v271_v24 }
 0x693   :  { %v276_v28 = vsel %vm275_vm15, %v668_v21, %v272_v25 }
 0x694   :  { %v281_v31 = vsel %vm278_vm0, %v280_v29, %v276_v28  ;;  %v432_v28 = vld [vmem:[#allocation2 + $0xc] sm:$0x3] }
 0x695   :  { %v284_v33 = vmul.f32 %v281_v31, %v229_v9 }
 0x6f2   :  { %v287_v30 = vpop.permute.xlu0 %286 }
 0x6f3   :  { %v289_v32 = vmul.f32 %v287_v30, %v281_v31 }
 0x6f5   :  { %291 = vrot.lane.b32.xlu1 %v289_v32, %s809_s27 }
 0x767   :  { %v292_v34 = vpop.permute.xlu1 %291 }
 0x768   :  { %v294_v35 = vadd.f32 %v292_v34, %v284_v33 }
 0x76a   :  { %669 = vtanh.f32 %v294_v35 }
 0x770   :  { %v670_v36 = vpop.eup %669 }
 0x771   :  { %297 = vrot.lane.b32.xlu2 %v670_v36, %s809_s27 }
 0x7cb   :  { %v298_v37 = vpop.permute.xlu2 %297 }
 0x7cc   :  { %v300_v38 = vmul.f32 %v298_v37, %v281_v31 }
 0x7ce   :  { %304 = vrot.lane.b32.xlu0 %v300_v38, %s812_s0 }
 0x840   :  { %v305_v39 = vpop.permute.xlu0 %304 }
 0x841   :  { %620 = vmatmul.msk.f32.vlgmr.msra.gmra.mxu3 %vm106_vm4, %v305_v39 }
 0x8c4   :  { %v325_v41 = vpop.f32.mrf.mxu3 }
 0x8c5   :  { %v328_v42 = vadd.f32 %v325_v41, %v302_v40 }
 0x8c7   :  { %671 = vtanh.f32 %v328_v42  ;;  %v621_v44 = vmul.f32 -1.442695, %v328_v42 }
 0x8c9   :  { %673 = vpow2.f32 %v621_v44 }
 0x8cd   :  { %v672_v43 = vpop.eup %671 }
 0x8ce   :  { %351 = vrot.lane.b32.xlu1 %v672_v43, %s809_s27 }
 0x8cf   :  { %v674_v45 = vpop.eup %673 }
 0x8d0   :  { %v332_v46 = vadd.f32 1.0, %v674_v45 }
 0x8d2   :  { %675 = vrcp.f32 %v332_v46  ;;  %v344_v52 = vand.u32 2147483648, %v332_v46  ;;  %vm338_vm2 = vweird.f32 %v332_v46  ;;  %v342_v53 = vand.u32 2147483647, %v332_v46 }
 0x8d4   :  { %v345_v55 = vor.u32 1.1754944e-38, %v344_v52  ;;  %vm343_vm5 = vcmp.eq.f32.partialorder %v342_v53, 8.507059e+37 }
 0x8d8   :  { %v676_v47 = vpop.eup %675 }
 0x8d9   :  { %v334_v48 = vmul.f32 %v676_v47, %v332_v46  ;;  %vm339_vm1 = vweird.f32 %v676_v47 }
 0x8da   :  { %vm340_vm3 = vmor %vm338_vm2, %vm339_vm1 }
 0x8db   :  { %v335_v49 = vsub.f32 1.0, %v334_v48 }
 0x8dd   :  { %v336_v50 = vmul.f32 %v676_v47, %v335_v49 }
 0x8df   :  { %v337_v51 = vadd.f32 %v676_v47, %v336_v50 }
 0x8e1   :  { %v341_v54 = vsel %vm340_vm3, %v676_v47, %v337_v51 }
 0x8e2   :  { %v346_v57 = vsel %vm343_vm5, %v345_v55, %v341_v54  ;;  %v497_v54 = vld [vmem:[#allocation2 + $0xe] sm:$0x3] }
 0x8e3   :  { %v349_v59 = vmul.f32 %v346_v57, %v294_v35 }
 0x940   :  { %v352_v56 = vpop.permute.xlu1 %351 }
 0x941   :  { %v354_v58 = vmul.f32 %v352_v56, %v346_v57 }
 0x943   :  { %356 = vrot.lane.b32.xlu2 %v354_v58, %s809_s27 }
 0x99d   :  { %v357_v60 = vpop.permute.xlu2 %356 }
 0x99e   :  { %v359_v61 = vadd.f32 %v357_v60, %v349_v59 }
 0x9a0   :  { %677 = vtanh.f32 %v359_v61 }
 0x9a6   :  { %v678_v62 = vpop.eup %677 }
 0x9a7   :  { %362 = vrot.lane.b32.xlu0 %v678_v62, %s809_s27 }
 0xa19   :  { %v363_v63 = vpop.permute.xlu0 %362 }
 0xa1a   :  { %v365_v0 = vmul.f32 %v363_v63, %v346_v57 }
 0xa1c   :  { %369 = vrot.lane.b32.xlu1 %v365_v0, %s812_s0 }
 0xa8e   :  { %v370_v1 = vpop.permute.xlu1 %369 }
 0xa8f   :  { %622 = vmatmul.msk.f32.vlgmr.msrb.gmra.mxu0 %vm106_vm4, %v370_v1 }
 0xb0c   :  { %v390_v3 = vpop.f32.mrf.mxu0 }
 0xb0d   :  { %v393_v4 = vadd.f32 %v390_v3, %v367_v2 }
 0xb0f   :  { %679 = vtanh.f32 %v393_v4  ;;  %v623_v6 = vmul.f32 -1.442695, %v393_v4 }
 0xb11   :  { %681 = vpow2.f32 %v623_v6 }
 0xb15   :  { %v680_v5 = vpop.eup %679 }
 0xb16   :  { %416 = vrot.lane.b32.xlu2 %v680_v5, %s809_s27 }
 0xb17   :  { %v682_v7 = vpop.eup %681 }
 0xb18   :  { %v397_v8 = vadd.f32 1.0, %v682_v7 }
 0xb1a   :  { %683 = vrcp.f32 %v397_v8  ;;  %v409_v14 = vand.u32 2147483648, %v397_v8  ;;  %vm403_vm7 = vweird.f32 %v397_v8  ;;  %v407_v15 = vand.u32 2147483647, %v397_v8 }
 0xb1c   :  { %v410_v17 = vor.u32 1.1754944e-38, %v409_v14  ;;  %vm408_vm9 = vcmp.eq.f32.partialorder %v407_v15, 8.507059e+37  ;;  %v563_v14 = vld [vmem:[#allocation7 + $0x10] sm:$0xff]  ;;  %v562_v15 = vld [vmem:[#allocation7 + $0x8] sm:$0xff] }
 0xb20   :  { %v684_v9 = vpop.eup %683 }
 0xb21   :  { %v399_v10 = vmul.f32 %v684_v9, %v397_v8  ;;  %vm404_vm6 = vweird.f32 %v684_v9 }
 0xb22   :  { %vm405_vm8 = vmor %vm403_vm7, %vm404_vm6 }
 0xb23   :  { %v400_v11 = vsub.f32 1.0, %v399_v10 }
 0xb25   :  { %v401_v12 = vmul.f32 %v684_v9, %v400_v11 }
 0xb27   :  { %v402_v13 = vadd.f32 %v684_v9, %v401_v12 }
 0xb29   :  { %v406_v16 = vsel %vm405_vm8, %v684_v9, %v402_v13  ;;  %v564_v13 = vld [vmem:[#allocation7 + $0x18] sm:$0xff] }
 0xb2a   :  { %v411_v19 = vsel %vm408_vm9, %v410_v17, %v406_v16  ;;  %586 = vmatpush.msrb.mxu3 %v564_v13  ;;  %v561_v16 = vld [vmem:[#allocation7] sm:$0xff] }
 0xb2b   :  { %v414_v21 = vmul.f32 %v411_v19, %v359_v61 }
 0xb2c   :  { %587 = vmatpush.msrb.mxu3 %v563_v14 }
 0xb2e   :  { %588 = vmatpush.msrb.mxu3 %v562_v15 }
 0xb30   :  { %589 = vmatpush.msrb.mxu3 %v561_v16 }
 0xb70   :  { %v417_v18 = vpop.permute.xlu2 %416 }
 0xb71   :  { %v419_v20 = vmul.f32 %v417_v18, %v411_v19 }
 0xb73   :  { %421 = vrot.lane.b32.xlu0 %v419_v20, %s809_s27  ;;  %v638_v20 = vld [vmem:[%s899_s3] ss:$0 sm:$0xff] }
 0xbe5   :  { %v422_v22 = vpop.permute.xlu0 %421 }
 0xbe6   :  { %v424_v23 = vadd.f32 %v422_v22, %v414_v21 }
 0xbe8   :  { %685 = vtanh.f32 %v424_v23 }
 0xbee   :  { %v686_v24 = vpop.eup %685 }
 0xbef   :  { %427 = vrot.lane.b32.xlu1 %v686_v24, %s809_s27 }
 0xc61   :  { %v428_v25 = vpop.permute.xlu1 %427 }
 0xc62   :  { %v430_v26 = vmul.f32 %v428_v25, %v411_v19 }
 0xc64   :  { %434 = vrot.lane.b32.xlu2 %v430_v26, %s812_s0 }
 0xcbe   :  { %v435_v27 = vpop.permute.xlu2 %434 }
 0xcbf   :  { %624 = vmatmul.msk.f32.vlgmr.msrb.gmra.mxu1 %vm106_vm4, %v435_v27 }
 0xd3c   :  { %v455_v29 = vpop.f32.mrf.mxu1 }
 0xd3d   :  { %v458_v30 = vadd.f32 %v455_v29, %v432_v28 }
 0xd3f   :  { %687 = vtanh.f32 %v458_v30  ;;  %v625_v32 = vmul.f32 -1.442695, %v458_v30 }
 0xd41   :  { %689 = vpow2.f32 %v625_v32 }
 0xd45   :  { %v688_v31 = vpop.eup %687 }
 0xd46   :  { %481 = vrot.lane.b32.xlu0 %v688_v31, %s809_s27 }
 0xd47   :  { %v690_v33 = vpop.eup %689 }
 0xd48   :  { %v462_v34 = vadd.f32 1.0, %v690_v33 }
 0xd4a   :  { %691 = vrcp.f32 %v462_v34  ;;  %v474_v40 = vand.u32 2147483648, %v462_v34  ;;  %vm468_vm11 = vweird.f32 %v462_v34  ;;  %v472_v41 = vand.u32 2147483647, %v462_v34 }
 0xd4c   :  { %v475_v43 = vor.u32 1.1754944e-38, %v474_v40  ;;  %vm473_vm13 = vcmp.eq.f32.partialorder %v472_v41, 8.507059e+37 }
 0xd50   :  { %v692_v35 = vpop.eup %691 }
 0xd51   :  { %v464_v36 = vmul.f32 %v692_v35, %v462_v34  ;;  %vm469_vm10 = vweird.f32 %v692_v35 }
 0xd52   :  { %vm470_vm12 = vmor %vm468_vm11, %vm469_vm10 }
 0xd53   :  { %v465_v37 = vsub.f32 1.0, %v464_v36 }
 0xd55   :  { %v466_v38 = vmul.f32 %v692_v35, %v465_v37 }
 0xd57   :  { %v467_v39 = vadd.f32 %v692_v35, %v466_v38 }
 0xd59   :  { %v471_v42 = vsel %vm470_vm12, %v692_v35, %v467_v39 }
 0xd5a   :  { %v476_v45 = vsel %vm473_vm13, %v475_v43, %v471_v42 }
 0xd5b   :  { %v479_v47 = vmul.f32 %v476_v45, %v424_v23 }
 0xdb8   :  { %v482_v44 = vpop.permute.xlu0 %481 }
 0xdb9   :  { %v484_v46 = vmul.f32 %v482_v44, %v476_v45 }
 0xdbb   :  { %486 = vrot.lane.b32.xlu1 %v484_v46, %s809_s27 }
 0xe2d   :  { %v487_v48 = vpop.permute.xlu1 %486 }
 0xe2e   :  { %v489_v49 = vadd.f32 %v487_v48, %v479_v47 }
 0xe30   :  { %693 = vtanh.f32 %v489_v49 }
 0xe36   :  { %v694_v50 = vpop.eup %693 }
 0xe37   :  { %492 = vrot.lane.b32.xlu2 %v694_v50, %s809_s27 }
 0xe91   :  { %v493_v51 = vpop.permute.xlu2 %492 }
 0xe92   :  { %v495_v52 = vmul.f32 %v493_v51, %v476_v45 }
 0xe94   :  { %499 = vrot.lane.b32.xlu0 %v495_v52, %s812_s0 }
 0xf06   :  { %v500_v53 = vpop.permute.xlu0 %499 }
 0xf07   :  { %626 = vmatmul.msk.f32.vlgmr.msrb.gmra.mxu2 %vm106_vm4, %v500_v53 }
 0xf8a   :  { %v520_v55 = vpop.f32.mrf.mxu2 }
 0xf8b   :  { %v523_v56 = vadd.f32 %v520_v55, %v497_v54 }
 0xf8d   :  { %695 = vtanh.f32 %v523_v56  ;;  %v627_v58 = vmul.f32 -1.442695, %v523_v56 }
 0xf8f   :  { %697 = vpow2.f32 %v627_v58 }
 0xf93   :  { %v696_v57 = vpop.eup %695 }
 0xf94   :  { %546 = vrot.lane.b32.xlu1 %v696_v57, %s809_s27 }
 0xf95   :  { %v698_v59 = vpop.eup %697 }
 0xf96   :  { %v527_v60 = vadd.f32 1.0, %v698_v59 }
 0xf98   :  { %699 = vrcp.f32 %v527_v60  ;;  %v539_v2 = vand.u32 2147483648, %v527_v60  ;;  %vm533_vm15 = vweird.f32 %v527_v60  ;;  %v537_v3 = vand.u32 2147483647, %v527_v60 }
 0xf9a   :  { %v540_v5 = vor.u32 1.1754944e-38, %v539_v2  ;;  %vm538_vm1 = vcmp.eq.f32.partialorder %v537_v3, 8.507059e+37 }
 0xf9e   :  { %v700_v61 = vpop.eup %699 }
 0xf9f   :  { %v529_v62 = vmul.f32 %v700_v61, %v527_v60  ;;  %vm534_vm14 = vweird.f32 %v700_v61 }
 0xfa0   :  { %vm535_vm0 = vmor %vm533_vm15, %vm534_vm14 }
 0xfa1   :  { %v530_v63 = vsub.f32 1.0, %v529_v62 }
 0xfa3   :  { %v531_v0 = vmul.f32 %v700_v61, %v530_v63 }
 0xfa5   :  { %v532_v1 = vadd.f32 %v700_v61, %v531_v0 }
 0xfa7   :  { %v536_v4 = vsel %vm535_vm0, %v700_v61, %v532_v1 }
 0xfa8   :  { %v541_v7 = vsel %vm538_vm1, %v540_v5, %v536_v4 }
 0xfa9   :  { %v544_v9 = vmul.f32 %v541_v7, %v489_v49 }
0x1006   :  { %v547_v6 = vpop.permute.xlu1 %546 }
0x1007   :  { %v549_v8 = vmul.f32 %v547_v6, %v541_v7 }
0x1009   :  { %551 = vrot.lane.b32.xlu2 %v549_v8, %s809_s27 }
0x1063   :  { %v552_v10 = vpop.permute.xlu2 %551 }
0x1064   :  { %v554_v11 = vadd.f32 %v552_v10, %v544_v9 }
0x1066   :  { %701 = vtanh.f32 %v554_v11 }
0x106c   :  { %v702_v12 = vpop.eup %701 }
0x106d   :  { %557 = vrot.lane.b32.xlu0 %v702_v12, %s809_s27 }
0x10df   :  { %v558_v17 = vpop.permute.xlu0 %557 }
0x10e0   :  { %v560_v18 = vmul.f32 %v558_v17, %v541_v7 }
0x10e2   :  { %570 = vrot.lane.b32.xlu1 %v560_v18, %s812_s0 }
0x1154   :  { %v571_v19 = vpop.permute.xlu1 %570 }
0x1155   :  { %628 = vmatmul.msk.f32.vlgmr.msrb.gmra.mxu3 %vm106_vm4, %v571_v19 }
0x11d8   :  { %v591_v21 = vpop.f32.mrf.mxu3 }
0x11d9   :  { %v592_v22 = vadd.f32 %v638_v20, %v591_v21 }
0x11db   :  { %594 = vst [vmem:[#allocation8] sm:$0x3] %v592_v22 }
0x11dc   :  { %605 = dma.vmem_to_hbm [thread:$0]  %s601_s9, 32, %s603_s12, [#allocation4]  }
0x11dd   :  { %803 = dma.done.wait [#allocation4], 32  }
0x11de   :  { %804 = vsyncadd [#allocation4], 4294967264 }
0x11df   :  { %610 = vsyncpa [#allocation3], 1 }
0x11e0   :  { %611 = vsyncpa [#allocation6], 1 }
0x11e1   :  { %612 = vsyncpa [#allocation4], 1 }

</bundles_post_ra>
